<compile_context>
chip_gen: v5e
topology: v5e:2x2
jax: 0.10.0
libtpu: 0.0.40
codegen_flags: <defaults>
</compile_context>

<pallas_src>
import jax
import jax.numpy as jnp
from jax.experimental import pallas as pl
from jax.experimental.pallas import tpu as pltpu

_EPS = 1e-8
_MAX_TILE_P = 8192              # lane-axis tile cap
_F32_BLOCK_BUDGET = 512 * 1024  # bytes per (C, TILE_P) f32 temporary (safe on
                                # v5e's 16 MiB default scoped VMEM and v7x)


def _pick_tile_p(hw_pad: int, c: int) -> int:
    """Largest multiple-of-128 divisor of hw_pad within the VMEM budget."""
    cap = (_F32_BLOCK_BUDGET // (4 * max(c, 1))) // 128 * 128
    cap = max(128, min(_MAX_TILE_P, cap))
    best = 128
    t = 128
    limit = min(cap, hw_pad)
    while t <= limit:
        if hw_pad % t == 0:
            best = t
        t += 128
    return best


def _kl_kernel(p1_ref, p2_ref, pm_ref, um_ref, out_ref):
    # out_ref: (2, TILE_P) per-lane accumulators for the current batch element
    # (row 0 = positive-mask weighted, row 1 = unlabeled-mask weighted).
    # It is resident in VMEM across the pixel-tile ("arbitrary") grid axis.
    @pl.when(pl.program_id(1) == 0)
    def _():
        out_ref[...] = jnp.zeros_like(out_ref)

    x1 = p1_ref[...].astype(jnp.float32)   # (C, TILE_P)
    x2 = p2_ref[...].astype(jnp.float32)   # (C, TILE_P)

    def softmax_log(x):
        # q = softmax(x, axis=0) + 1e-8 ; returns (q, log(q)).
        # Exact torch semantics: log(softmax(x) + eps), not fused log-softmax.
        m = jnp.max(x, axis=0, keepdims=True)        # (1, T)
        e = jnp.exp(x - m)                           # (C, T)
        s = jnp.sum(e, axis=0, keepdims=True)        # (1, T)
        q = e * pl.reciprocal(s) + _EPS              # (C, T)
        return q, jnp.log(q)

    q1, l1 = softmax_log(x1)
    q2, l2 = softmax_log(x2)

    # KLDiv(log q1, q2) + KLDiv(log q2, q1), summed over channels:
    #   sum_c (q1 - q2) * (l1 - l2)
    loss_raw = jnp.sum((q1 - q2) * (l1 - l2), axis=0, keepdims=True)  # (1, T)

    pm = pm_ref[...]   # (1, T) float32
    um = um_ref[...]   # (1, T) float32
    out_ref[0:1, :] += loss_raw * pm
    out_ref[1:2, :] += loss_raw * um


def kl_loss(pred1, pred2, positive_mask, unlabeled_mask, equal_weight=False):
    """JAX/Pallas equivalent of KLLoss.forward.

    pred1, pred2:   (N, C, H, W) logits, any float dtype (kept native; cast to
                    float32 inside the kernel).
    positive_mask:  (H, W) float/bool mask.
    unlabeled_mask: (H, W) float/bool mask.
    Returns a scalar float32 loss.
    """
    N, C, H, W = pred1.shape
    assert pred2.shape == pred1.shape
    assert positive_mask.shape == (H, W)
    assert unlabeled_mask.shape == (H, W)

    HW = H * W
    # Free reshape: NCHW -> (N, C, HW). No transpose, no dtype copy.
    p1 = pred1.reshape(N, C, HW)
    p2 = pred2.reshape(N, C, HW)

    pm = positive_mask.astype(jnp.float32).reshape(1, HW)
    um = unlabeled_mask.astype(jnp.float32).reshape(1, HW)

    # Pad the pixel axis only when HW is not a multiple of 128 (rare).
    hw_pad = ((HW + 127) // 128) * 128
    tile_p = _pick_tile_p(hw_pad, C)
    if hw_pad != HW:
        pad = hw_pad - HW
        # Zero-padded logits -> uniform softmax (finite, KL contribution 0 once
        # multiplied by the zero-padded masks).
        p1 = jnp.pad(p1, ((0, 0), (0, 0), (0, pad)))
        p2 = jnp.pad(p2, ((0, 0), (0, 0), (0, pad)))
        pm = jnp.pad(pm, ((0, 0), (0, pad)))
        um = jnp.pad(um, ((0, 0), (0, pad)))

    n_tiles = hw_pad // tile_p
    grid = (N, n_tiles)

    partials = pl.pallas_call(
        _kl_kernel,
        out_shape=jax.ShapeDtypeStruct((N, 2, tile_p), jnp.float32),
        grid_spec=pltpu.PrefetchScalarGridSpec(
            num_scalar_prefetch=0,
            grid=grid,
            in_specs=[
                pl.BlockSpec((None, C, tile_p), lambda n, i: (n, 0, i)),
                pl.BlockSpec((None, C, tile_p), lambda n, i: (n, 0, i)),
                pl.BlockSpec((1, tile_p), lambda n, i: (0, i)),
                pl.BlockSpec((1, tile_p), lambda n, i: (0, i)),
            ],
            out_specs=pl.BlockSpec((None, 2, tile_p), lambda n, i: (n, 0, 0)),
        ),
        compiler_params=pltpu.CompilerParams(
            dimension_semantics=("parallel", "arbitrary")),
    )(p1, p2, pm, um)

    sums = jnp.sum(partials, axis=(0, 2))   # (2,): [p_loss_sum, u_loss_sum]
    p_loss_sum = sums[0]
    u_loss_sum = sums[1]

    # In torch, mask.sum() is over the un-broadcast (1, H, W) mask (no batch
    # multiplication), so the denominators come from the original masks.
    pmask_sum = jnp.sum(positive_mask.astype(jnp.float32))
    umask_sum = jnp.sum(unlabeled_mask.astype(jnp.float32))

    if not equal_weight:
        return (p_loss_sum + u_loss_sum) / (pmask_sum + umask_sum)
    return p_loss_sum / pmask_sum + u_loss_sum / umask_sum


if __name__ == "__main__":
    key = jax.random.PRNGKey(0)
    k1, k2, k3, k4 = jax.random.split(key, 4)

    N, C, H, W = 2, 4, 16, 16
    pred1 = jax.random.normal(k1, (N, C, H, W), dtype=jnp.float32)
    pred2 = jax.random.normal(k2, (N, C, H, W), dtype=jnp.float32)
    positive_mask = (jax.random.uniform(k3, (H, W)) > 0.7).astype(jnp.float32)
    unlabeled_mask = (jax.random.uniform(k4, (H, W)) > 0.3).astype(jnp.float32)

    loss = kl_loss(pred1, pred2, positive_mask, unlabeled_mask,
                   equal_weight=False)
    jax.block_until_ready(loss)
    print("KERNEL_OK")
</pallas_src>

<mosaic_0001>
module attributes {stable_mosaic.version = 11 : i64} {
  func.func @_kl_kernel(%arg0: i32, %arg1: i32, %arg2: memref<1x4x256xf32, #tpu.memory_space<vmem>>, %arg3: memref<1x4x256xf32, #tpu.memory_space<vmem>>, %arg4: memref<1x256xf32, #tpu.memory_space<vmem>>, %arg5: memref<1x256xf32, #tpu.memory_space<vmem>>, %arg6: memref<1x2x256xf32, #tpu.memory_space<vmem>>) attributes {dimension_semantics = [#tpu.dimension_semantics<parallel>, #tpu.dimension_semantics<arbitrary>], iteration_bounds = array<i64: 2, 1>, scalar_prefetch = 0 : i64, scratch_operands = 0 : i64, tpu.core_type = #tpu.core_type<tc>, window_params = [{transform_indices = @transform_0, window_bounds = array<i64: 1, 4, 256>}, {transform_indices = @transform_1, window_bounds = array<i64: 1, 4, 256>}, {transform_indices = @transform_2, window_bounds = array<i64: 1, 256>}, {transform_indices = @transform_3, window_bounds = array<i64: 1, 256>}, {transform_indices = @transform_4, window_bounds = array<i64: 1, 2, 256>}]} {
    %c0_i32 = arith.constant 0 : i32
    %0 = arith.cmpi eq, %arg1, %c0_i32 : i32
    %1 = arith.extui %0 : i1 to i32
    %c0_i32_0 = arith.constant 0 : i32
    %2 = arith.cmpi ne, %1, %c0_i32_0 : i32
    scf.if %2 {
      %cst_27 = arith.constant 0.000000e+00 : f32
      %54 = vector.broadcast %cst_27 : f32 to vector<2x256xf32>
      %c0_28 = arith.constant 0 : index
      %c0_29 = arith.constant 0 : index
      %c0_30 = arith.constant 0 : index
      %55 = vector.load %arg6[%c0_28, %c0_29, %c0_30] : memref<1x2x256xf32, #tpu.memory_space<vmem>>, vector<1x2x256xf32>
      %56 = vector.shape_cast %55 : vector<1x2x256xf32> to vector<2x256xf32>
      %57 = vector.shape_cast %54 : vector<2x256xf32> to vector<1x2x256xf32>
      tpu.vector_store %arg6[%c0_28, %c0_29, %c0_30], %57 {strides = array<i32>} : memref<1x2x256xf32, #tpu.memory_space<vmem>>, vector<1x2x256xf32>,
    } else {
    }
    %c0 = arith.constant 0 : index
    %c0_1 = arith.constant 0 : index
    %c0_2 = arith.constant 0 : index
    %3 = vector.load %arg2[%c0, %c0_1, %c0_2] : memref<1x4x256xf32, #tpu.memory_space<vmem>>, vector<1x4x256xf32>
    %4 = vector.shape_cast %3 : vector<1x4x256xf32> to vector<4x256xf32>
    %c0_3 = arith.constant 0 : index
    %c0_4 = arith.constant 0 : index
    %c0_5 = arith.constant 0 : index
    %5 = vector.load %arg3[%c0_3, %c0_4, %c0_5] : memref<1x4x256xf32, #tpu.memory_space<vmem>>, vector<1x4x256xf32>
    %6 = vector.shape_cast %5 : vector<1x4x256xf32> to vector<4x256xf32>
    %cst = arith.constant dense<0xFF800000> : vector<256xf32>
    %7 = vector.multi_reduction <maximumf>, %4, %cst [0] : vector<4x256xf32> to vector<256xf32>
    %8 = vector.shape_cast %7 : vector<256xf32> to vector<1x256xf32>
    %9 = vector.broadcast %8 : vector<1x256xf32> to vector<4x256xf32>
    %10 = arith.subf %4, %9 : vector<4x256xf32>
    %11 = math.exp %10 : vector<4x256xf32>
    %cst_6 = arith.constant dense<0.000000e+00> : vector<256xf32>
    %12 = vector.multi_reduction <add>, %11, %cst_6 [0] : vector<4x256xf32> to vector<256xf32>
    %13 = vector.shape_cast %12 : vector<256xf32> to vector<1x256xf32>
    %14 = tpu.reciprocal %13 : vector<1x256xf32> -> vector<1x256xf32>
    %15 = vector.broadcast %14 : vector<1x256xf32> to vector<4x256xf32>
    %16 = arith.mulf %11, %15 : vector<4x256xf32>
    %cst_7 = arith.constant 9.99999993E-9 : f32
    %17 = vector.broadcast %cst_7 : f32 to vector<4x256xf32>
    %18 = arith.addf %16, %17 : vector<4x256xf32>
    %19 = math.log %18 : vector<4x256xf32>
    %cst_8 = arith.constant dense<0xFF800000> : vector<256xf32>
    %20 = vector.multi_reduction <maximumf>, %6, %cst_8 [0] : vector<4x256xf32> to vector<256xf32>
    %21 = vector.shape_cast %20 : vector<256xf32> to vector<1x256xf32>
    %22 = vector.broadcast %21 : vector<1x256xf32> to vector<4x256xf32>
    %23 = arith.subf %6, %22 : vector<4x256xf32>
    %24 = math.exp %23 : vector<4x256xf32>
    %cst_9 = arith.constant dense<0.000000e+00> : vector<256xf32>
    %25 = vector.multi_reduction <add>, %24, %cst_9 [0] : vector<4x256xf32> to vector<256xf32>
    %26 = vector.shape_cast %25 : vector<256xf32> to vector<1x256xf32>
    %27 = tpu.reciprocal %26 : vector<1x256xf32> -> vector<1x256xf32>
    %28 = vector.broadcast %27 : vector<1x256xf32> to vector<4x256xf32>
    %29 = arith.mulf %24, %28 : vector<4x256xf32>
    %cst_10 = arith.constant 9.99999993E-9 : f32
    %30 = vector.broadcast %cst_10 : f32 to vector<4x256xf32>
    %31 = arith.addf %29, %30 : vector<4x256xf32>
    %32 = math.log %31 : vector<4x256xf32>
    %33 = arith.subf %18, %31 : vector<4x256xf32>
    %34 = arith.subf %19, %32 : vector<4x256xf32>
    %35 = arith.mulf %33, %34 : vector<4x256xf32>
    %cst_11 = arith.constant dense<0.000000e+00> : vector<256xf32>
    %36 = vector.multi_reduction <add>, %35, %cst_11 [0] : vector<4x256xf32> to vector<256xf32>
    %37 = vector.shape_cast %36 : vector<256xf32> to vector<1x256xf32>
    %c0_12 = arith.constant 0 : index
    %c0_13 = arith.constant 0 : index
    %38 = vector.load %arg4[%c0_12, %c0_13] : memref<1x256xf32, #tpu.memory_space<vmem>>, vector<1x256xf32>
    %c0_14 = arith.constant 0 : index
    %c0_15 = arith.constant 0 : index
    %39 = vector.load %arg5[%c0_14, %c0_15] : memref<1x256xf32, #tpu.memory_space<vmem>>, vector<1x256xf32>
    %c0_16 = arith.constant 0 : index
    %c0_17 = arith.constant 0 : index
    %c0_18 = arith.constant 0 : index
    %40 = vector.load %arg6[%c0_16, %c0_17, %c0_18] : memref<1x2x256xf32, #tpu.memory_space<vmem>>, vector<1x1x256xf32>
    %41 = vector.shape_cast %40 : vector<1x1x256xf32> to vector<1x256xf32>
    %42 = arith.mulf %37, %38 : vector<1x256xf32>
    %43 = arith.addf %41, %42 : vector<1x256xf32>
    %c0_19 = arith.constant 0 : index
    %c0_20 = arith.constant 0 : index
    %c0_21 = arith.constant 0 : index
    %44 = vector.load %arg6[%c0_19, %c0_20, %c0_21] : memref<1x2x256xf32, #tpu.memory_space<vmem>>, vector<1x1x256xf32>
    %45 = vector.shape_cast %44 : vector<1x1x256xf32> to vector<1x256xf32>
    %46 = vector.shape_cast %43 : vector<1x256xf32> to vector<1x1x256xf32>
    tpu.vector_store %arg6[%c0_19, %c0_20, %c0_21], %46 {strides = array<i32>} : memref<1x2x256xf32, #tpu.memory_space<vmem>>, vector<1x1x256xf32>,
    %c0_22 = arith.constant 0 : index
    %c1 = arith.constant 1 : index
    %c0_23 = arith.constant 0 : index
    %47 = vector.load %arg6[%c0_22, %c1, %c0_23] : memref<1x2x256xf32, #tpu.memory_space<vmem>>, vector<1x1x256xf32>
    %48 = vector.shape_cast %47 : vector<1x1x256xf32> to vector<1x256xf32>
    %49 = arith.mulf %37, %39 : vector<1x256xf32>
    %50 = arith.addf %48, %49 : vector<1x256xf32>
    %c0_24 = arith.constant 0 : index
    %c1_25 = arith.constant 1 : index
    %c0_26 = arith.constant 0 : index
    %51 = vector.load %arg6[%c0_24, %c1_25, %c0_26] : memref<1x2x256xf32, #tpu.memory_space<vmem>>, vector<1x1x256xf32>
    %52 = vector.shape_cast %51 : vector<1x1x256xf32> to vector<1x256xf32>
    %53 = vector.shape_cast %50 : vector<1x256xf32> to vector<1x1x256xf32>
    tpu.vector_store %arg6[%c0_24, %c1_25, %c0_26], %53 {strides = array<i32>} : memref<1x2x256xf32, #tpu.memory_space<vmem>>, vector<1x1x256xf32>,
    return
  }
  func.func @transform_0(%arg0: i32, %arg1: i32) -> (i32, i32, i32) {
    %c0_i32 = arith.constant 0 : i32
    %c0_i32_0 = arith.constant 0 : i32
    return %arg0, %c0_i32, %arg1 : i32, i32, i32
  }
  func.func @transform_1(%arg0: i32, %arg1: i32) -> (i32, i32, i32) {
    %c0_i32 = arith.constant 0 : i32
    %c0_i32_0 = arith.constant 0 : i32
    return %arg0, %c0_i32, %arg1 : i32, i32, i32
  }
  func.func @transform_2(%arg0: i32, %arg1: i32) -> (i32, i32) {
    %c0_i32 = arith.constant 0 : i32
    %c0_i32_0 = arith.constant 0 : i32
    return %c0_i32, %arg1 : i32, i32
  }
  func.func @transform_3(%arg0: i32, %arg1: i32) -> (i32, i32) {
    %c0_i32 = arith.constant 0 : i32
    %c0_i32_0 = arith.constant 0 : i32
    return %c0_i32, %arg1 : i32, i32
  }
  func.func @transform_4(%arg0: i32, %arg1: i32) -> (i32, i32, i32) {
    %c0_i32 = arith.constant 0 : i32
    %c0_i32_0 = arith.constant 0 : i32
    %c0_i32_1 = arith.constant 0 : i32
    return %arg0, %c0_i32, %c0_i32_0 : i32, i32, i32
  }
}

</mosaic_0001>

<bundles_post_ra>
// kernel: tpu_custom_call.1
= control target key start
LH: loop header
LB: loop body
LE: loop exit
PB: predicated region body
PF: predicated region fallthrough
CT: control target
= control target key end

     0   :  { %s1233_s0 = inlined_call_operand.hbm [shape: f32[2,4,256], index: 0, kind: input, shape index: {}]   ;;  %s1234_s1 = inlined_call_operand.hbm [shape: f32[2,4,256], index: 1, kind: input, shape index: {}]   ;;  %s1235_s2 = inlined_call_operand.hbm [shape: f32[1,256], index: 2, kind: input, shape index: {}]   ;;  %s1236_s3 = inlined_call_operand.vmem [shape: f32[1,256], index: 3, kind: input, shape index: {}]   ;;  %s1237_s4 = inlined_call_operand.hbm [shape: f32[2,2,256], index: 4, kind: output, shape index: {}]  }
   0x1   :  { %1241 = sst [smem:[#allocation17_spill]] %s1235_s2 }
   0x2   :  { %9 = vsyncpa [#allocation3], 0 }
   0x3   :  { %11 = vsyncpa [#allocation3 + $0x1], 0 }
   0x4   :  { %12 = vsyncpa [#allocation6], 0 }
   0x5   :  { %14 = vsyncpa [#allocation6 + $0x1], 0 }
   0x6   :  { %15 = vsyncpa [#allocation4], 0 }
   0x7   :  { %17 = vsyncpa [#allocation4 + $0x1], 0  ;;  %s1036_s15 = smov 0   ;;  %s1038_s16 = smov 0  }
   0x8   :  { %s1040_s17 = smov 0   ;;  %s1042_s18 = smov 0  }
   0x9   :  { %s1044_s19 = smov 0   ;;  %s1046_s20 = smov 0  }
   0xa LB: > { %1242 = sst [smem:[#allocation13_spill]] %s1003_s19  ;;  %s1067_s21 = sadd.s32 4294967295, %s1007_s20   ;;  %s1007_s20 = sphi %s1046_s20, %s23_s20   ;;  %s1003_s19 = sphi %s1044_s19, %s1257_s19   ;;  %s999_s18 = sphi %s1042_s18, %s1256_s18   ;;  %s995_s17 = sphi %s1040_s17, %s1260_s17   ;;  %s991_s16 = sphi %s1038_s16, %s1259_s16   ;;  %s987_s15 = sphi %s1036_s15, %s1258_s15  }
   0xb   : > { %s706_s22 = sadd.s32 4294967294, %s1007_s20   ;;  %p57_p0 = scmp.ne.s32.totalorder %s991_s16, %s987_s15 }
   0xc   : > { %p58_p1 = scmp.eq.s32.totalorder %s1067_s21, 0  ;;  %p161_p2 = scmp.eq.s32.totalorder %s1067_s21, 1 }
   0xd   : > { %p167_p3 = scmp.eq.s32.totalorder %s706_s22, 1  ;;  %p707_p5 = scmp.ge.s32.totalorder %s1007_s20, 1 }
   0xe   : > { %p1076_p4 = por %p58_p1, %p57_p0  ;;  %p174_p7 = scmp.lt.s32.totalorder %s1007_s20, 3 }
   0xf   : > { %p1081_p6 = por %p167_p3, %p57_p0  ;;  %s1246_s2 = sld [smem:[#allocation17_spill]] }
  0x10   : > { %p1089_p8 = pnand %p707_p5, %p174_p7  ;;  %p710_p9 = scmp.ge.s32.totalorder %s1007_s20, 2 }
  0x11   : > { %s1244_s24 = scalar_select %p1081_p6, 1, 0 }
  0x12   : > { %p742_p10 = pneg %p1089_p8  ;;  %s1009_s29 = smov [#allocation7]  }
  0x13   : > { %1245 = sst [smem:[#allocation14_spill]] %s1244_s24  ;;  %s190_s30 = sshll.u32 %s1009_s29, 4  ;;  %s191_s30 = int_to_ptr.vmem [resolvable:$true] %s190_s30 }
  0x14   : > { %p743_p11 = pnand %p742_p10, %p58_p1  ;;  %s35_s5 = sadd.s32 1, %s1003_s19 }
  0x15   : > { %s188_s27 = sshll.u32 %s1246_s2, 4  ;;  %p37_p12 = scmp.ge.s32.totalorder %s35_s5, 2  ;;  %s189_s27 = int_to_ptr.hbm [resolvable:$true] %s188_s27 }
  0x16   : > { %745 = dma.hbm_to_vmem [thread:$0]  (!%p743_p11), %s189_s27, 32, %s191_s30, [#allocation6]  }
  0x17   : > { %s44_s6 = sadd.s32 1, %s995_s17  ;;  %p51_p13 = scmp.ne.s32.totalorder %s995_s17, %s991_s16 }
  0x18   : > { %p52_p0 = scmp.eq.s32.totalorder %s1007_s20, 0  ;;  %s1262_s5 = smov (%p37_p12, %s35_s5), 0 }
  0x19   : > { %1248 = sst [smem:[#allocation15_spill]] %s1262_s5  ;;  %p1111_p5 = por %p161_p2, %p51_p13 }
  0x1a   : > { %p1105_p3 = por %p52_p0, %p51_p13  ;;  %s39_s9 = ssub.s32 %s1003_s19, %s1262_s5 }
  0x1b   : > { %p758_p7 = scmp.lt.s32.totalorder %s1007_s20, 2  ;;  %p42_p10 = scmp.eq.s32.totalorder %s39_s9, 0 }
  0x1c   : > { %s209_s10 = sand.u32 1, %s995_s17   ;;  %s729_s13 = sshll.u32 %s1003_s19, 3 }
  0x1d   : > { %s711_s11 = sshll.u32 %s209_s10, 3  ;;  %s220_s25 = scalar_lea.hbm %s1233_s0, %s729_s13 }
  0x1e   : > { %s1120_s12 = scalar_select %p42_p10, %s995_s17, %s44_s6  }
  0x1f   : > { %s213_s26 = scalar_lea.vmem [#allocation2], %s711_s11  ;;  %s222_s29 = sshll.u32 %s220_s25, 4  ;;  %s223_s29 = int_to_ptr.hbm [resolvable:$true] %s222_s29 }
  0x20   : > { %1251 = sst [smem:[#allocation16_spill]] %s1120_s12  ;;  %s224_s27 = sshll.u32 %s213_s26, 4  ;;  %s225_s27 = int_to_ptr.vmem [resolvable:$true] %s224_s27 }
  0x21   : > { %p747_p2 = pnand %p758_p7, %p1105_p3  ;;  %s242_s9 = scalar_lea.hbm %s1234_s1, %s729_s13 }
  0x22   : > { %s231_s5 = sand.u32 1, %s1007_s20   ;;  %s210_s24 = scalar_lea.sflag [#allocation3], %s209_s10 }
  0x23   : > { %749 = dma.hbm_to_vmem [thread:$0]  (!%p747_p2), %s223_s29, 128, %s225_s27, %s210_s24  }
  0x24   : > { %s244_s6 = sshll.u32 %s242_s9, 4  ;;  %s235_s19 = scalar_lea.vmem [#allocation5], %s711_s11  ;;  %s245_s6 = int_to_ptr.hbm [resolvable:$true] %s244_s6 }
  0x25   : > { %s246_s12 = sshll.u32 %s235_s19, 4  ;;  %s232_s14 = scalar_lea.sflag [#allocation6], %s231_s5  ;;  %s247_s12 = int_to_ptr.vmem [resolvable:$true] %s246_s12 }
  0x26   : > { %752 = dma.hbm_to_vmem [thread:$0]  (!%p747_p2), %s245_s6, 128, %s247_s12, %s232_s14  }
  0x27   : > { %255 = sbr.rel (%p1089_p8) target bundleno = 220 (0xdc), region = 36  ;;  %s1135_s7 = sand.u32 (!%p1089_p8), 1, %s991_s16  }
  0x28   : > { %s718_s2 = sshll.u32 (!%p1089_p8), %s1135_s7, 3  ;;  %s258_s13 = scalar_lea.sflag (!%p1089_p8), [#allocation3], %s1135_s7 }
  0x29   : > { %s261_s10 = scalar_lea.vmem (!%p1089_p8), [#allocation2], %s718_s2 }
  0x2c   : > { %970 = dma.done.wait (%p1076_p4), %s258_s13, 128  }
  0x2d   : > { %972 = vsyncadd (%p1076_p4), %s258_s13, 4294967168  ;;  %s267_s19 = sand.u32 1, %s1067_s21   ;;  %s1144_s28 = scalar_lea.vmem [#allocation5], %s718_s2 }
  0x2e   : > { %s268_s24 = scalar_lea.sflag [#allocation6], %s267_s19 }
  0x2f   : > { %974 = dma.done.wait (%p1076_p4), %s268_s24, 128  }
  0x30   : > { %976 = vsyncadd (%p1076_p4), %s268_s24, 4294967168 }
  0x31   : > { %978 = dma.done.wait (%p58_p1), [#allocation6], 32  }
  0x32   : > { %980 = vsyncadd (%p58_p1), [#allocation6], 4294967264  ;;  %v324_v0 = vld [vmem:[%s261_s10] sm:$0xff]  ;;  %vm332_vm0 = vcmask 1043456   ;;  %v325_v22 = vld [vmem:[%s1144_s28] sm:$0xff]  ;;  %s721_s21 = sshll.u32 %s1135_s7, 2 }
  0x33   : > { %327 = vst [vmem:[#allocation1] ss:$2 sm:$0xff] %v324_v0  ;;  %s1172_s23 = scalar_lea.vmem [#allocation8], %s721_s21  ;;  %s731_s12 = sshll.u32 %s999_s18, 2 }
  0x34   : > { %s570_s26 = scalar_lea.hbm %s1237_s4, %s731_s12  ;;  %s572_s18 = sshll.u32 %s1172_s23, 4  ;;  %s573_s18 = int_to_ptr.vmem [resolvable:$true] %s572_s18 }
  0x35   : > { %s574_s27 = sshll.u32 %s570_s26, 4  ;;  %s559_s29 = scalar_lea.sflag [#allocation4], %s1135_s7  ;;  %s575_s27 = int_to_ptr.hbm [resolvable:$true] %s574_s27 }
  0x36   : > { %s931_s30 = sshra.s32 %s575_s27, 4  ;;  %s937_s2 = scalar_lea.hbm %s1237_s4, 8  ;;  %s932_s30 = int_to_ptr.hbm [resolvable:$true] %s931_s30 }
  0x37   : > { %s933_s9 = scalar_lea.hbm %s932_s30, 4  ;;  %p938_p11 = scmp.lt.s32.totalorder %s932_s30, %s1237_s4 }
  0x38   : > { %p934_p1 = scmp.ne.s32.totalorder %s932_s30, %s933_s9  ;;  %p939_p12 = scmp.lt.s32.totalorder %s937_s2, %s933_s9 }
  0x3a   : > { %v328_v1 = vld.sshfl [vmem:[#allocation1] sm:$0xff pattern:$0x75316420]  ;;  %v329_v2 = vld.sshfl [vmem:[#allocation1 + $0x8] sm:$0xff pattern:$0x75316420]  ;;  %p935_p4 = pnand %p934_p1, %p1111_p5  ;;  %p940_p13 = por %p939_p12, %p938_p11 }
  0x3b   : > { %v333_v3 = vsel %vm332_vm0, %v328_v1, -inf  ;;  %v340_v4 = vsel %vm332_vm0, %v329_v2, -inf }
  0x3c   : > { %v334_v5 = vrot.slane %v333_v3, 4  ;;  %v341_v6 = vrot.slane %v340_v4, 4  ;;  %p936_p8 = pneg %p935_p4 }
  0x3e   : > { %v335_v7 = vmax.f32 %v333_v3, %v334_v5  ;;  %v342_v8 = vmax.f32 %v340_v4, %v341_v6  ;;  %p941_p0 = pnand %p940_p13, %p936_p8 }
  0x40   : > { %v336_v9 = vrot.slane %v335_v7, 2  ;;  %v343_v10 = vrot.slane %v342_v8, 2 }
  0x42   : > { %v337_v11 = vmax.f32 %v335_v7, %v336_v9  ;;  %v344_v12 = vmax.f32 %v342_v8, %v343_v10 }
  0x44   : > { %v338_v13 = vrot.slane %v337_v11, 1  ;;  %v345_v14 = vrot.slane %v344_v12, 1 }
  0x46   : > { %v346_v15 = vmax.f32 %v344_v12, %v345_v14  ;;  %v339_v16 = vmax.f32 %v337_v11, %v338_v13 }
  0x48   : > { %v349_v17 = vrot.slane %v346_v15, 4 }
  0x4a   : > { %v350_v18 = vsel %vm332_vm0, %v339_v16, %v349_v17 }
  0x4b   : > { %v352_v19 = vsub.f32 %v324_v0, %v350_v18 }
  0x4d   : > { %v353_v20 = vmul.f32 1.442695, %v352_v19 }
  0x4f   : > { %811 = vpow2.f32 %v353_v20 }
  0x55   : > { %v1157_v21 = vpop.eup %811 }
  0x56   : > { %356 = vst [vmem:[#allocation1] ss:$2 sm:$0xff] %v1157_v21 }
  0x5d   : > { %v357_v23 = vld.sshfl [vmem:[#allocation1] sm:$0xff pattern:$0x75316420]  ;;  %v358_v24 = vld.sshfl [vmem:[#allocation1 + $0x8] sm:$0xff pattern:$0x75316420] }
  0x5e   : > { %413 = vst [vmem:[#allocation1] ss:$2 sm:$0xff] %v325_v22  ;;  %v368_v27 = vsel %vm332_vm0, %v358_v24, 0.0  ;;  %v361_v35 = vsel %vm332_vm0, %v357_v23, 0.0 }
  0x5f   : > { %v369_v32 = vrot.slane %v368_v27, 4  ;;  %v362_v39 = vrot.slane %v361_v35, 4 }
  0x61   : > { %v370_v36 = vadd.f32 %v369_v32, %v368_v27  ;;  %v363_v45 = vadd.f32 %v362_v39, %v361_v35 }
  0x63   : > { %v371_v42 = vrot.slane %v370_v36, 2  ;;  %v364_v50 = vrot.slane %v363_v45, 2 }
  0x65   : > { %v414_v25 = vld.sshfl [vmem:[#allocation1] sm:$0xff pattern:$0x75316420]  ;;  %v415_v26 = vld.sshfl [vmem:[#allocation1 + $0x8] sm:$0xff pattern:$0x75316420]  ;;  %v372_v47 = vadd.f32 %v371_v42, %v370_v36  ;;  %v365_v55 = vadd.f32 %v364_v50, %v363_v45 }
  0x66   : > { %v418_v28 = vsel %vm332_vm0, %v414_v25, -inf  ;;  %v425_v29 = vsel %vm332_vm0, %v415_v26, -inf }
  0x67   : > { %v419_v30 = vrot.slane %v418_v28, 4  ;;  %v426_v31 = vrot.slane %v425_v29, 4  ;;  %v373_v53 = vrot.slane %v372_v47, 1  ;;  %v366_v57 = vrot.slane %v365_v55, 1 }
  0x69   : > { %v420_v33 = vmax.f32 %v418_v28, %v419_v30  ;;  %v427_v34 = vmax.f32 %v425_v29, %v426_v31  ;;  %v374_v56 = vadd.f32 %v373_v53, %v372_v47  ;;  %v367_v59 = vadd.f32 %v366_v57, %v365_v55 }
  0x6b   : > { %v421_v37 = vrot.slane %v420_v33, 2  ;;  %v428_v38 = vrot.slane %v427_v34, 2  ;;  %v400_v20 = vand.u32 2147483648, %v374_v56  ;;  %vm394_vm2 = vweird.f32 %v374_v56 }
  0x6c   : > { %v398_v23 = vand.u32 2147483647, %v374_v56  ;;  %v386_v27 = vand.u32 2147483648, %v367_v59  ;;  %vm380_vm6 = vweird.f32 %v367_v59  ;;  %v384_v30 = vand.u32 2147483647, %v367_v59 }
  0x6d   : > { %v422_v40 = vmax.f32 %v420_v33, %v421_v37  ;;  %v429_v41 = vmax.f32 %v427_v34, %v428_v38  ;;  %v401_v25 = vor.u32 1.1754944e-38, %v400_v20  ;;  %v1010_v33 = vmov 0.0  }
  0x6e   : > { %vm399_vm5 = vcmp.eq.f32.partialorder %v398_v23, 8.507059e+37  ;;  %323 = vst [vmem:[%s1172_s23] sm:$0xf] %v1010_v33  ;;  %v387_v37 = vor.u32 1.1754944e-38, %v386_v27  ;;  %vm385_vm8 = vcmp.eq.f32.partialorder %v384_v30, 8.507059e+37 }
  0x6f   : > { %v423_v43 = vrot.slane %v422_v40, 1  ;;  %v430_v44 = vrot.slane %v429_v41, 1 }
  0x71   : > { %v431_v46 = vmax.f32 %v429_v41, %v430_v44  ;;  %v424_v48 = vmax.f32 %v422_v40, %v423_v43 }
  0x73   : > { %v434_v49 = vrot.slane %v431_v46, 4 }
  0x75   : > { %v435_v51 = vsel %vm332_vm0, %v424_v48, %v434_v49 }
  0x76   : > { %v437_v52 = vsub.f32 %v325_v22, %v435_v51 }
  0x78   : > { %v438_v54 = vmul.f32 1.442695, %v437_v52 }
  0x7a   : > { %813 = vpow2.f32 %v438_v54 }
  0x7b   : > { %815 = vrcp.f32 %v374_v56 }
  0x7c   : > { %817 = vrcp.f32 %v367_v59 }
  0x80   : > { %v1166_v58 = vpop.eup %813 }
  0x81   : > { %441 = vst [vmem:[#allocation1] ss:$2 sm:$0xff] %v1166_v58  ;;  %v816_v60 = vpop.eup %815 }
  0x82   : > { %v390_v61 = vmul.f32 %v816_v60, %v374_v56  ;;  %v818_v4 = vpop.eup %817  ;;  %vm395_vm1 = vweird.f32 %v816_v60 }
  0x83   : > { %v376_v8 = vmul.f32 %v818_v4, %v367_v59  ;;  %vm396_vm3 = vmor %vm394_vm2, %vm395_vm1  ;;  %vm381_vm4 = vweird.f32 %v818_v4 }
  0x84   : > { %v391_v5 = vsub.f32 1.0, %v390_v61  ;;  %vm382_vm7 = vmor %vm380_vm6, %vm381_vm4 }
  0x85   : > { %v377_v14 = vsub.f32 1.0, %v376_v8 }
  0x86   : > { %v392_v11 = vmul.f32 %v816_v60, %v391_v5 }
  0x87   : > { %v378_v22 = vmul.f32 %v818_v4, %v377_v14 }
  0x88   : > { %v442_v62 = vld.sshfl [vmem:[#allocation1] sm:$0xff pattern:$0x75316420]  ;;  %v443_v63 = vld.sshfl [vmem:[#allocation1 + $0x8] sm:$0xff pattern:$0x75316420]  ;;  %v393_v17 = vadd.f32 %v816_v60, %v392_v11 }
  0x89   : > { %v446_v0 = vsel %vm332_vm0, %v442_v62, 0.0  ;;  %v453_v1 = vsel %vm332_vm0, %v443_v63, 0.0  ;;  %v379_v26 = vadd.f32 %v818_v4, %v378_v22 }
  0x8a   : > { %v447_v2 = vrot.slane %v446_v0, 4  ;;  %v454_v3 = vrot.slane %v453_v1, 4  ;;  %v397_v24 = vsel %vm396_vm3, %v816_v60, %v393_v17 }
  0x8b   : > { %v402_v28 = vsel %vm399_vm5, %v401_v25, %v397_v24  ;;  %v383_v34 = vsel %vm382_vm7, %v818_v4, %v379_v26 }
  0x8c   : > { %v448_v6 = vadd.f32 %v447_v2, %v446_v0  ;;  %v455_v7 = vadd.f32 %v454_v3, %v453_v1  ;;  %v405_v35 = vrot.slane %v402_v28, 4  ;;  %v388_v40 = vsel %vm385_vm8, %v387_v37, %v383_v34  ;;  %v722_v34 = vld [vmem:[%s1172_s23 + $0x1] ss:$2 sm:$0x3] }
  0x8e   : > { %v449_v9 = vrot.slane %v448_v6, 2  ;;  %v456_v10 = vrot.slane %v455_v7, 2  ;;  %v406_v43 = vsel %vm332_vm0, %v388_v40, %v405_v35 }
  0x8f   : > { %v408_v51 = vmul.f32 %v1157_v21, %v406_v43 }
  0x90   : > { %v450_v12 = vadd.f32 %v449_v9, %v448_v6  ;;  %v457_v13 = vadd.f32 %v456_v10, %v455_v7 }
  0x91   : > { %v409_v59 = vadd.f32 1e-08, %v408_v51 }
  0x92   : > { %v451_v15 = vrot.slane %v450_v12, 1  ;;  %v458_v16 = vrot.slane %v457_v13, 1 }
  0x94   : > { %v452_v18 = vadd.f32 %v451_v15, %v450_v12  ;;  %v459_v19 = vadd.f32 %v458_v16, %v457_v13  ;;  %v520_v15 = vld [vmem:[#allocation7] sm:$0x3]  ;;  %v521_v16 = vld [vmem:[%s1236_s3] sm:$0x3] }
  0x95   : > { %v525_v22 = vperm.slane %v520_v15, 1  ;;  %v546_v23 = vperm.slane %v521_v16, 1  ;;  %v524_v26 = vperm.slane %v520_v15, 0  ;;  %v545_v27 = vperm.slane %v521_v16, 0 }
  0x96   : > { %819 = vrcp.f32 %v452_v18  ;;  %v485_v42 = vand.u32 2147483648, %v459_v19  ;;  %v483_v45 = vand.u32 2147483647, %v459_v19  ;;  %vm465_vm11 = vweird.f32 %v452_v18 }
  0x97   : > { %821 = vrcp.f32 %v459_v19  ;;  %v471_v47 = vand.u32 2147483648, %v452_v18  ;;  %v469_v49 = vand.u32 2147483647, %v452_v18  ;;  %vm479_vm13 = vweird.f32 %v459_v19 }
  0x98   : > { %v486_v52 = vor.u32 1.1754944e-38, %v485_v42  ;;  %vm484_vm15 = vcmp.eq.f32.partialorder %v483_v45, 8.507059e+37  ;;  %823 = vlog2.f32 %v409_v59 }
  0x99   : > { %v472_v55 = vor.u32 1.1754944e-38, %v471_v47  ;;  %vm470_vm1 = vcmp.eq.f32.partialorder %v469_v49, 8.507059e+37 }
  0x9c   : > { %v820_v29 = vpop.eup %819 }
  0x9d   : > { %v822_v31 = vpop.eup %821  ;;  %v461_v32 = vmul.f32 %v820_v29, %v452_v18  ;;  %vm466_vm9 = vweird.f32 %v820_v29 }
  0x9e   : > { %v475_v36 = vmul.f32 %v822_v31, %v459_v19  ;;  %vm480_vm10 = vweird.f32 %v822_v31  ;;  %vm1176_vm12 = vmor %vm465_vm11, %vm466_vm9  ;;  %v824_v21 = vpop.eup %823 }
  0x9f   : > { %v462_v38 = vsub.f32 1.0, %v461_v32  ;;  %vm481_vm14 = vmor %vm479_vm13, %vm480_vm10  ;;  %v411_v1 = vmul.f32 0.6931472, %v824_v21 }
  0xa0   : > { %v476_v39 = vsub.f32 1.0, %v475_v36 }
  0xa1   : > { %v463_v41 = vmul.f32 %v820_v29, %v462_v38 }
  0xa2   : > { %v477_v44 = vmul.f32 %v822_v31, %v476_v39 }
  0xa3   : > { %v464_v46 = vadd.f32 %v820_v29, %v463_v41 }
  0xa4   : > { %v478_v50 = vadd.f32 %v822_v31, %v477_v44 }
  0xa5   : > { %v468_v53 = vsel %vm1176_vm12, %v820_v29, %v464_v46  ;;  %v537_v29 = vlaneseq }
  0xa6   : > { %v482_v54 = vsel %vm481_vm14, %v822_v31, %v478_v50  ;;  %v473_v60 = vsel %vm470_vm1, %v472_v55, %v468_v53  ;;  %v522_v31 = vld [vmem:[%s1172_s23] ss:$2 sm:$0x3] }
  0xa7   : > { %v487_v56 = vsel %vm484_vm15, %v486_v52, %v482_v54  ;;  %vm539_vm2 = vcmp.lt.s32.totalorder %v537_v29, 256 }
  0xa8   : > { %v490_v57 = vrot.slane %v487_v56, 4 }
  0xaa   : > { %v491_v61 = vsel %vm332_vm0, %v473_v60, %v490_v57 }
  0xab   : > { %v493_v62 = vmul.f32 %v1166_v58, %v491_v61 }
  0xad   : > { %v494_v63 = vadd.f32 1e-08, %v493_v62 }
  0xaf   : > { %825 = vlog2.f32 %v494_v63  ;;  %v497_v3 = vsub.f32 %v409_v59, %v494_v63 }
  0xb5   : > { %v826_v0 = vpop.eup %825 }
  0xb6   : > { %v496_v2 = vmul.f32 0.6931472, %v826_v0 }
  0xb8   : > { %v498_v4 = vsub.f32 %v411_v1, %v496_v2 }
  0xba   : > { %v499_v5 = vmul.f32 %v498_v4, %v497_v3 }
  0xbc   : > { %501 = vst [vmem:[#allocation1] ss:$2 sm:$0xff] %v499_v5 }
  0xc3   : > { %v502_v6 = vld.sshfl [vmem:[#allocation1] sm:$0xff pattern:$0x75316420]  ;;  %v503_v7 = vld.sshfl [vmem:[#allocation1 + $0x8] sm:$0xff pattern:$0x75316420] }
  0xc4   : > { %v506_v8 = vsel %vm332_vm0, %v502_v6, 0.0  ;;  %v513_v9 = vsel %vm332_vm0, %v503_v7, 0.0  ;;  %vm533_vm0 = vcmask 1040384  }
  0xc5   : > { %v507_v10 = vrot.slane %v506_v8, 4  ;;  %v514_v58 = vrot.slane %v513_v9, 4 }
  0xc7   : > { %v508_v11 = vadd.f32 %v507_v10, %v506_v8  ;;  %v515_v12 = vadd.f32 %v514_v58, %v513_v9 }
  0xc9   : > { %v509_v13 = vrot.slane %v508_v11, 2  ;;  %v516_v14 = vrot.slane %v515_v12, 2 }
  0xcb   : > { %v510_v17 = vadd.f32 %v509_v13, %v508_v11  ;;  %v517_v18 = vadd.f32 %v516_v14, %v515_v12 }
  0xcd   : > { %v511_v19 = vrot.slane %v510_v17, 1  ;;  %v518_v20 = vrot.slane %v517_v18, 1 }
  0xcf   : > { %v512_v24 = vadd.f32 %v511_v19, %v510_v17  ;;  %v519_v25 = vadd.f32 %v518_v20, %v517_v18 }
  0xd1   : > { %v529_v28 = vmul.f32 %v525_v22, %v519_v25  ;;  %v550_v30 = vmul.f32 %v546_v23, %v519_v25  ;;  %v528_v32 = vmul.f32 %v524_v26, %v512_v24  ;;  %v549_v35 = vmul.f32 %v545_v27, %v512_v24 }
  0xd3   : > { %v532_v33 = vrot.slane %v529_v28, 7  ;;  %v553_v36 = vrot.slane %v550_v30, 7 }
  0xd5   : > { %v534_v37 = vsel %vm533_vm0, %v528_v32, %v532_v33  ;;  %v554_v38 = vsel %vm533_vm0, %v549_v35, %v553_v36 }
  0xd6   : > { %v536_v39 = vadd.f32 %v534_v37, %v522_v31  ;;  %v556_v40 = vadd.f32 %v722_v34, %v554_v38 }
  0xd8   : > { %541 = vst.msk [vmem:[%s1172_s23] ss:$2 sm:$0x3] %vm539_vm2, %v536_v39 }
  0xd9   : > { %723 = vst.msk [vmem:[%s1172_s23 + $0x1] ss:$2 sm:$0x3] %vm539_vm2, %v556_v40 }
  0xda   : > { %944 = shalt.err (!%p941_p0)
}
  0xdb   : > { %740 = dma.vmem_to_hbm [thread:$0]  (%p1111_p5), %s573_s18, 64, %s575_s27, %s559_s29  }
  0xdc PF: > { %s586_s19 = sand.u32 1, %s987_s15   ;;  %p754_p3 = pnand %p710_p9, %p1081_p6 }
  0xdd   : > { %s587_s24 = scalar_lea.sflag [#allocation4], %s586_s19 }
  0xde   : > { %p755_p7 = pneg %p754_p3 }
  0xe0   : > { %982 = dma.done.wait (%p755_p7), %s587_s24, 64  }
  0xe1   : > { %984 = vsyncadd (%p755_p7), %s587_s24, 4294967232  ;;  %s23_s20 = sadd.s32 1, %s1007_s20   ;;  %s1255_s28 = sld [smem:[#allocation16_spill]] }
  0xe2   : > { %p20_p10 = scmp.ge.s32.totalorder %s23_s20, 4   ;;  %s1256_s18 = sld [smem:[#allocation13_spill]] }
  0xe3   : > { %s1257_s19 = sld [smem:[#allocation15_spill]]  ;;  %s1258_s15 = smov %s991_s16 }
  0xe4   : > { %s1259_s16 = smov %s995_s17  ;;  %22 = sbr.rel (!%p20_p10) target bundleno = 10 (0xa), region = 107 }
  0xe7   : > { %s1260_s17 = smov %s1255_s28 }
  0xe9   :  { %593 = vsyncpa [#allocation3], 1 }
  0xea   :  { %595 = vsyncpa [#allocation3 + $0x1], 1 }
  0xeb   :  { %596 = vsyncpa [#allocation6], 1 }
  0xec   :  { %598 = vsyncpa [#allocation6 + $0x1], 1 }
  0xed   :  { %599 = vsyncpa [#allocation4], 1 }
  0xee   :  { %601 = vsyncpa [#allocation4 + $0x1], 1 }

</bundles_post_ra>
